<compile_context>
chip_gen: v7x
topology: tpu7x:2x2x1
jax: 0.10.0
libtpu: 0.0.40
codegen_flags: <defaults>
</compile_context>

<pallas_src>
import functools

import jax
import jax.numpy as jnp
from jax.experimental import pallas as pl
from jax.experimental.pallas import tpu as pltpu


def _kd_kernel(s_ref, t_ref, out_ref, *, temperature, valid_rows, tile_s,
               mask_tail):
    # s_ref / t_ref: (BT, C, TS, 128) blocks.  Softmax axis is axis=1 (C).
    s = s_ref[...].astype(jnp.float32)
    t = t_ref[...].astype(jnp.float32)

    inv_temp = jnp.float32(1.0 / float(temperature))
    s_t = s * inv_temp
    t_t = t * inv_temp

    # log-softmax pieces for the student (channel axis = 1, a non-minor dim:
    # reduces are plain elementwise ops across full vregs).
    s_max = jnp.max(s_t, axis=1, keepdims=True)            # (BT,1,TS,128)
    s_shift = s_t - s_max
    s_sum = jnp.sum(jnp.exp(s_shift), axis=1, keepdims=True)

    # softmax pieces for the teacher.
    t_max = jnp.max(t_t, axis=1, keepdims=True)
    t_shift = t_t - t_max
    t_exp = jnp.exp(t_shift)
    t_sum = jnp.sum(t_exp, axis=1, keepdims=True)

    # Exact reciprocal: approx=True (EUP vrcp) injects a ~1e-4/pixel bias into
    # the log term, which summed over the image exceeds the reference rtol.
    inv_t_sum = pl.reciprocal(t_sum, approx=False)

    # KL per pixel = sum_c t_prob*(t_shift - s_shift) + log(s_sum / t_sum)
    weighted = jnp.sum(t_exp * (t_shift - s_shift), axis=1, keepdims=True)
    kl = weighted * inv_t_sum + jnp.log(s_sum * inv_t_sum)  # (BT,1,TS,128)

    if mask_tail:
        # Only the last spatial tile can contain out-of-bounds (garbage) rows;
        # interior tiles take the unmasked path (no per-tile VALU filler).
        j = pl.program_id(1)
        is_last = j == pl.num_programs(1) - 1

        @pl.when(is_last)
        def _():
            row = j * tile_s + jax.lax.broadcasted_iota(jnp.int32, kl.shape, 2)
            masked = jnp.where(row < valid_rows, kl, jnp.float32(0.0))
            out_ref[...] = jnp.reshape(jnp.sum(masked), (1, 1, 1, 1))

        @pl.when(jnp.logical_not(is_last))
        def _():
            out_ref[...] = jnp.reshape(jnp.sum(kl), (1, 1, 1, 1))
    else:
        out_ref[...] = jnp.reshape(jnp.sum(kl), (1, 1, 1, 1))


def _vmem_limit_bytes():
    """Generation-aware scoped-VMEM limit (~3/4 of physical VMEM)."""
    try:
        cap = int(pltpu.get_tpu_info().vmem_capacity_bytes)
    except Exception:
        cap = 64 * 1024 * 1024          # conservative (v7x-sized) fallback
    return int(min((cap * 3) // 4, 100 * 1024 * 1024))


def _pick_tiling(n, c, s_rows, itemsize, vmem_limit, tile_s=None,
                 batch_tile=None):
    """Pick (batch_tile, spatial_tile, num_spatial_tiles, mask_tail)."""
    # Per-element VMEM cost of one block: 2 inputs x 2 pipeline buffers in the
    # input dtype + ~8 live f32 intermediates the compiler may materialize.
    per_elem = 4 * itemsize + 8 * 4
    cap_elems = max(8 * 128, (vmem_limit * 3 // 4) // per_elem)

    if tile_s is None:
        if c * s_rows * 128 <= cap_elems:
            tile_s = s_rows                       # whole sample in one block
        else:
            tile_s = max(8, (cap_elems // (c * 128)) // 8 * 8)
            if tile_s >= s_rows:
                tile_s = s_rows
    else:
        # Sanitize user-supplied tile: multiple of 8, or the full extent.
        tile_s = max(8, -(-int(tile_s) // 8) * 8)
        if tile_s >= s_rows:
            tile_s = s_rows
    num_s = -(-s_rows // tile_s)
    mask_tail = (s_rows % tile_s) != 0

    if batch_tile is None:
        bt_cap = max(1, cap_elems // (c * tile_s * 128))
    else:
        bt_cap = max(1, int(batch_tile))
    bt = 1
    for cand in range(min(n, bt_cap), 0, -1):
        if n % cand == 0:                          # bt must divide N exactly
            bt = cand
            break
    return bt, tile_s, num_s, mask_tail


def distill_loss(student_pred, teacher_pred, temperature=1.0, loss_weight=1.0,
                 tile_s=None, batch_tile=None):
    """Pallas-TPU forward of DistillLoss.  Inputs: (N, C, H, W) arrays."""
    n, c, hgt, wid = student_pred.shape
    assert teacher_pred.shape == student_pred.shape
    hw = hgt * wid

    # NCHW -> (N, C, HW): collapsing trailing contiguous dims is free.
    s3 = student_pred.reshape(n, c, hw)
    t3 = teacher_pred.reshape(n, c, hw)

    # Lane-dense layout: pad HW to a multiple of 128 (zero padding contributes
    # exactly 0 KL: uniform vs uniform softmax) and split into (S, 128) so the
    # minor two tile dims are full vregs regardless of C.
    hw_pad = -(-hw // 128) * 128
    if hw_pad != hw:
        pad = ((0, 0), (0, 0), (0, hw_pad - hw))
        s3 = jnp.pad(s3, pad)
        t3 = jnp.pad(t3, pad)
    s_rows = hw_pad // 128
    s4 = s3.reshape(n, c, s_rows, 128)
    t4 = t3.reshape(n, c, s_rows, 128)

    vmem_limit = _vmem_limit_bytes()
    bt, t_s, num_s, mask_tail = _pick_tiling(
        n, c, s_rows, jnp.dtype(student_pred.dtype).itemsize, vmem_limit,
        tile_s=tile_s, batch_tile=batch_tile)
    grid_n = n // bt

    kernel = functools.partial(
        _kd_kernel, temperature=float(temperature), valid_rows=s_rows,
        tile_s=t_s, mask_tail=mask_tail)

    partials = pl.pallas_call(
        kernel,
        out_shape=jax.ShapeDtypeStruct((grid_n, num_s, 1, 1), jnp.float32),
        grid_spec=pltpu.PrefetchScalarGridSpec(
            num_scalar_prefetch=0,
            grid=(grid_n, num_s),
            in_specs=[
                pl.BlockSpec((bt, c, t_s, 128), lambda i, j: (i, 0, j, 0)),
                pl.BlockSpec((bt, c, t_s, 128), lambda i, j: (i, 0, j, 0)),
            ],
            out_specs=pl.BlockSpec((1, 1, 1, 1), lambda i, j: (i, j, 0, 0)),
        ),
        compiler_params=pltpu.CompilerParams(
            # Every grid step is independent (per-step partial sums), so both
            # axes can be sharded across TensorCores (helps v7x when N is 1).
            dimension_semantics=("parallel", "parallel"),
            vmem_limit_bytes=vmem_limit),
    )(s4, t4)

    kl_sum = jnp.sum(partials)
    # kl_div(reduction='batchmean') divides by the leading (batch) dim only.
    return loss_weight * (kl_sum / n) * (temperature ** 2)


def _reference_loss(student, teacher, temperature=1.0, loss_weight=1.0):
    s = student.astype(jnp.float32)
    t = teacher.astype(jnp.float32)
    s_lp = jax.nn.log_softmax(s / temperature, axis=1)
    t_p = jax.nn.softmax(t / temperature, axis=1)
    t_lp = jax.nn.log_softmax(t / temperature, axis=1)
    kl = jnp.sum(t_p * (t_lp - s_lp)) / s.shape[0]
    return loss_weight * kl * temperature ** 2


if __name__ == "__main__":
    key = jax.random.PRNGKey(0)
    k1, k2, k3, k4, k5, k6 = jax.random.split(key, 6)

    # Case 1: module-typical small shape -> whole samples grouped into a
    # single block / single grid step.
    B, C, H, W = 2, 4, 16, 16
    student = jax.random.normal(k1, (B, C, H, W), jnp.float32)
    teacher = jax.random.normal(k2, (B, C, H, W), jnp.float32)
    out = distill_loss(student, teacher, temperature=2.0, loss_weight=1.0)
    out = jax.block_until_ready(out)
    ref = _reference_loss(student, teacher, 2.0, 1.0)
    assert jnp.allclose(out, ref, rtol=1e-4, atol=1e-4), (out, ref)

    # Case 2: HW not a multiple of 128 -> exercises the zero-pad path
    # (padded pixels contribute exactly 0 KL, no in-kernel mask).
    B2, C2, H2, W2 = 2, 3, 18, 18
    s2 = jax.random.normal(k3, (B2, C2, H2, W2), jnp.float32)
    t2 = jax.random.normal(k4, (B2, C2, H2, W2), jnp.float32)
    out2 = distill_loss(s2, t2, temperature=1.5, loss_weight=0.7)
    out2 = jax.block_until_ready(out2)
    ref2 = _reference_loss(s2, t2, 1.5, 0.7)
    assert jnp.allclose(out2, ref2, rtol=1e-4, atol=1e-4), (out2, ref2)

    # Case 3: forced small spatial tile (HW=1600 -> 13 rows of 128, TS=8)
    # -> exercises spatial tiling + the pl.when-guarded ragged-tail mask.
    B3, C3, H3, W3 = 2, 5, 40, 40
    s3 = jax.random.normal(k5, (B3, C3, H3, W3), jnp.float32)
    t3 = jax.random.normal(k6, (B3, C3, H3, W3), jnp.float32)
    out3 = distill_loss(s3, t3, temperature=1.5, loss_weight=0.7, tile_s=8)
    out3 = jax.block_until_ready(out3)
    ref3 = _reference_loss(s3, t3, 1.5, 0.7)
    assert jnp.allclose(out3, ref3, rtol=1e-4, atol=1e-4), (out3, ref3)

    print("KERNEL_OK")
</pallas_src>

<mosaic_0001>
module attributes {stable_mosaic.version = 11 : i64} {
  func.func @_kd_kernel(%arg0: i32, %arg1: i32, %arg2: memref<2x4x2x128xf32, #tpu.memory_space<vmem>>, %arg3: memref<2x4x2x128xf32, #tpu.memory_space<vmem>>, %arg4: memref<1x1x1x1xf32, #tpu.memory_space<vmem>>) attributes {dimension_semantics = [#tpu.dimension_semantics<parallel>, #tpu.dimension_semantics<parallel>], iteration_bounds = array<i64: 1, 1>, scalar_prefetch = 0 : i64, scratch_operands = 0 : i64, tpu.core_type = #tpu.core_type<tc>, window_params = [{transform_indices = @transform_0, window_bounds = array<i64: 2, 4, 2, 128>}, {transform_indices = @transform_1, window_bounds = array<i64: 2, 4, 2, 128>}, {transform_indices = @transform_2, window_bounds = array<i64: 1, 1, 1, 1>}]} {
    %c0 = arith.constant 0 : index
    %c0_0 = arith.constant 0 : index
    %c0_1 = arith.constant 0 : index
    %c0_2 = arith.constant 0 : index
    %0 = vector.load %arg2[%c0, %c0_0, %c0_1, %c0_2] : memref<2x4x2x128xf32, #tpu.memory_space<vmem>>, vector<2x4x2x128xf32>
    %c0_3 = arith.constant 0 : index
    %c0_4 = arith.constant 0 : index
    %c0_5 = arith.constant 0 : index
    %c0_6 = arith.constant 0 : index
    %1 = vector.load %arg3[%c0_3, %c0_4, %c0_5, %c0_6] : memref<2x4x2x128xf32, #tpu.memory_space<vmem>>, vector<2x4x2x128xf32>
    %cst = arith.constant 5.000000e-01 : f32
    %2 = vector.broadcast %cst : f32 to vector<2x4x2x128xf32>
    %3 = arith.mulf %0, %2 : vector<2x4x2x128xf32>
    %cst_7 = arith.constant 5.000000e-01 : f32
    %4 = vector.broadcast %cst_7 : f32 to vector<2x4x2x128xf32>
    %5 = arith.mulf %1, %4 : vector<2x4x2x128xf32>
    %cst_8 = arith.constant dense<0xFF800000> : vector<2x2x128xf32>
    %6 = vector.multi_reduction <maximumf>, %3, %cst_8 [1] : vector<2x4x2x128xf32> to vector<2x2x128xf32>
    %7 = vector.shape_cast %6 : vector<2x2x128xf32> to vector<2x1x2x128xf32>
    %8 = vector.broadcast %7 : vector<2x1x2x128xf32> to vector<2x4x2x128xf32>
    %9 = arith.subf %3, %8 : vector<2x4x2x128xf32>
    %10 = math.exp %9 : vector<2x4x2x128xf32>
    %cst_9 = arith.constant dense<0.000000e+00> : vector<2x2x128xf32>
    %11 = vector.multi_reduction <add>, %10, %cst_9 [1] : vector<2x4x2x128xf32> to vector<2x2x128xf32>
    %12 = vector.shape_cast %11 : vector<2x2x128xf32> to vector<2x1x2x128xf32>
    %cst_10 = arith.constant dense<0xFF800000> : vector<2x2x128xf32>
    %13 = vector.multi_reduction <maximumf>, %5, %cst_10 [1] : vector<2x4x2x128xf32> to vector<2x2x128xf32>
    %14 = vector.shape_cast %13 : vector<2x2x128xf32> to vector<2x1x2x128xf32>
    %15 = vector.broadcast %14 : vector<2x1x2x128xf32> to vector<2x4x2x128xf32>
    %16 = arith.subf %5, %15 : vector<2x4x2x128xf32>
    %17 = math.exp %16 : vector<2x4x2x128xf32>
    %cst_11 = arith.constant dense<0.000000e+00> : vector<2x2x128xf32>
    %18 = vector.multi_reduction <add>, %17, %cst_11 [1] : vector<2x4x2x128xf32> to vector<2x2x128xf32>
    %19 = vector.shape_cast %18 : vector<2x2x128xf32> to vector<2x1x2x128xf32>
    %20 = tpu.reciprocal %19 : vector<2x1x2x128xf32> -> vector<2x1x2x128xf32>
    %21 = arith.subf %16, %9 : vector<2x4x2x128xf32>
    %22 = arith.mulf %17, %21 : vector<2x4x2x128xf32>
    %cst_12 = arith.constant dense<0.000000e+00> : vector<2x2x128xf32>
    %23 = vector.multi_reduction <add>, %22, %cst_12 [1] : vector<2x4x2x128xf32> to vector<2x2x128xf32>
    %24 = vector.shape_cast %23 : vector<2x2x128xf32> to vector<2x1x2x128xf32>
    %25 = arith.mulf %24, %20 : vector<2x1x2x128xf32>
    %26 = arith.mulf %12, %20 : vector<2x1x2x128xf32>
    %27 = math.log %26 : vector<2x1x2x128xf32>
    %28 = arith.addf %25, %27 : vector<2x1x2x128xf32>
    %29 = vector.shape_cast %28 : vector<2x1x2x128xf32> to vector<1x2x1x2x128xf32>
    %cst_13 = arith.constant dense<0.000000e+00> : vector<1xf32>
    %30 = vector.multi_reduction <add>, %29, %cst_13 [1, 2, 3, 4] : vector<1x2x1x2x128xf32> to vector<1xf32>
    %31 = vector.shape_cast %30 : vector<1xf32> to vector<1x1x1x1x1xf32>
    %32 = vector.extract %31[0, 0, 0, 0, 0] : f32 from vector<1x1x1x1x1xf32>
    %33 = vector.broadcast %32 : f32 to vector<1x1x1x1xf32>
    %c0_14 = arith.constant 0 : index
    %c0_15 = arith.constant 0 : index
    %c0_16 = arith.constant 0 : index
    %c0_17 = arith.constant 0 : index
    %34 = vector.load %arg4[%c0_14, %c0_15, %c0_16, %c0_17] : memref<1x1x1x1xf32, #tpu.memory_space<vmem>>, vector<1x1x1x1xf32>
    tpu.vector_store %arg4[%c0_14, %c0_15, %c0_16, %c0_17], %33 {strides = array<i32>} : memref<1x1x1x1xf32, #tpu.memory_space<vmem>>, vector<1x1x1x1xf32>,
    return
  }
  func.func @transform_0(%arg0: i32, %arg1: i32) -> (i32, i32, i32, i32) {
    %c0_i32 = arith.constant 0 : i32
    %c0_i32_0 = arith.constant 0 : i32
    %c0_i32_1 = arith.constant 0 : i32
    return %arg0, %c0_i32, %arg1, %c0_i32_0 : i32, i32, i32, i32
  }
  func.func @transform_1(%arg0: i32, %arg1: i32) -> (i32, i32, i32, i32) {
    %c0_i32 = arith.constant 0 : i32
    %c0_i32_0 = arith.constant 0 : i32
    %c0_i32_1 = arith.constant 0 : i32
    return %arg0, %c0_i32, %arg1, %c0_i32_0 : i32, i32, i32, i32
  }
  func.func @transform_2(%arg0: i32, %arg1: i32) -> (i32, i32, i32, i32) {
    %c0_i32 = arith.constant 0 : i32
    %c0_i32_0 = arith.constant 0 : i32
    %c0_i32_1 = arith.constant 0 : i32
    return %arg0, %arg1, %c0_i32, %c0_i32_0 : i32, i32, i32, i32
  }
}

</mosaic_0001>

<bundles_post_ra>
// kernel: tpu_custom_call.1
= control target key start
LH: loop header
LB: loop body
LE: loop exit
PB: predicated region body
PF: predicated region fallthrough
CT: control target
= control target key end

     0   :  { %7 = vsyncpa [#allocation3], 0  ;;  %s543_s0 = inlined_call_operand.hbm [shape: f32[2,4,2,128], index: 0, kind: input, shape index: {}]   ;;  %s544_s1 = inlined_call_operand.hbm [shape: f32[2,4,2,128], index: 1, kind: input, shape index: {}]   ;;  %s545_s2 = inlined_call_operand.hbm [shape: f32[1,1,1,1], index: 2, kind: output, shape index: {}]  }
   0x1   :  { %8 = vsyncpa [#allocation6], 0 }
   0x2   :  { %9 = vsyncpa [#allocation4], 0  ;;  %s369_s9 = smov [#allocation2]   ;;  %s297_s13 = scalar_lea.hbm %s543_s0, 256 }
   0x3   :  { %s15_s10 = sshll.u32 %s369_s9, 4  ;;  %p298_p0 = scmp.ne.s32.totalorder %s543_s0, %s297_s13  ;;  %s16_s10 = int_to_ptr.vmem [resolvable:$true] %s15_s10 }
   0x4   :  { %p301_p1 = scmp.lt.u32.totalorder %s297_s13, %s543_s0 }
   0x6   :  { %p303_p2 = pnand %p301_p1, %p298_p0 }
   0x8   :  { %306 = shalt.err (!%p303_p2)
}
   0x9   :  { %s307_s18 = scalar_lea.vmem %s16_s10, 256  ;;  %p312_p4 = scmp.lt.s32.totalorder %s16_s10, %s16_s10 }
   0xa   :  { %p308_p3 = scmp.ne.s32.totalorder %s16_s10, %s307_s18  ;;  %p313_p5 = scmp.lt.s32.totalorder %s307_s18, %s307_s18 }
   0xc   :  { %p314_p6 = por %p313_p5, %p312_p4 }
   0xe   :  { %p315_p7 = pnand %p314_p6, %p308_p3 }
  0x10   :  { %318 = shalt.err (!%p315_p7)
}
  0x11   :  { %s370_s19 = smov 32   ;;  %s371_s20 = smov 2  }
  0x12   :  { %21 = dma.hbm_to_vmem [thread:$0]  %s543_s0, 256, %s16_s10, [#allocation3], %s370_s19, %s370_s19, %s371_s20  }
  0x13   :  { %s372_s23 = smov [#allocation5]   ;;  %s319_s27 = scalar_lea.hbm %s544_s1, 256 }
  0x14   :  { %s27_s24 = sshll.u32 %s372_s23, 4  ;;  %p320_p8 = scmp.ne.s32.totalorder %s544_s1, %s319_s27  ;;  %s28_s24 = int_to_ptr.vmem [resolvable:$true] %s27_s24 }
  0x15   :  { %p323_p9 = scmp.lt.u32.totalorder %s319_s27, %s544_s1 }
  0x17   :  { %p325_p10 = pnand %p323_p9, %p320_p8 }
  0x19   :  { %328 = shalt.err (!%p325_p10)
}
  0x1a   :  { %s329_s4 = scalar_lea.vmem %s28_s24, 256  ;;  %p334_p12 = scmp.lt.s32.totalorder %s28_s24, %s28_s24 }
  0x1b   :  { %p330_p11 = scmp.ne.s32.totalorder %s28_s24, %s329_s4  ;;  %p335_p13 = scmp.lt.s32.totalorder %s329_s4, %s329_s4 }
  0x1d   :  { %p336_p0 = por %p335_p13, %p334_p12 }
  0x1f   :  { %p337_p1 = pnand %p336_p0, %p330_p11 }
  0x21   :  { %340 = shalt.err (!%p337_p1)
}
  0x22   :  { %33 = dma.hbm_to_vmem [thread:$0]  %s544_s1, 256, %s28_s24, [#allocation6], %s370_s19, %s370_s19, %s371_s20  }
  0x23   :  { %363 = dma.done.wait [#allocation3], 256  }
  0x24   :  { %364 = vsyncadd [#allocation3], 4294967040 }
  0x25   :  { %365 = dma.done.wait [#allocation6], 256  }
  0x26   :  { %366 = vsyncadd [#allocation6], 4294967040  ;;  %v40_v0 = vld [vmem:[#allocation2] sm:$0x3]  ;;  %v41_v1 = vld [vmem:[#allocation2 + $0x2] sm:$0x3] }
  0x27   :  { %v42_v2 = vld [vmem:[#allocation2 + $0x4] sm:$0x3]  ;;  %vm72_vm0 = vcmask 1041408   ;;  %v43_v3 = vld [vmem:[#allocation2 + $0x6] sm:$0x3]  ;;  %v56_v16 = vmul.f32 0.5, %v40_v0 }
  0x28   :  { %v44_v4 = vld [vmem:[#allocation2 + $0x8] sm:$0x3]  ;;  %v45_v5 = vld [vmem:[#allocation2 + $0xa] sm:$0x3]  ;;  %v46_v6 = vld [vmem:[#allocation2 + $0xc] sm:$0x3] }
  0x29   :  { %v47_v7 = vld [vmem:[#allocation2 + $0xe] sm:$0x3]  ;;  %v48_v8 = vld [vmem:[#allocation5] sm:$0x3]  ;;  %v49_v9 = vld [vmem:[#allocation5 + $0x2] sm:$0x3] }
  0x2a   :  { %v50_v10 = vld [vmem:[#allocation5 + $0x4] sm:$0x3]  ;;  %v51_v11 = vld [vmem:[#allocation5 + $0x6] sm:$0x3]  ;;  %v52_v12 = vld [vmem:[#allocation5 + $0x8] sm:$0x3] }
  0x2b   :  { %v53_v13 = vld [vmem:[#allocation5 + $0xa] sm:$0x3]  ;;  %v54_v14 = vld [vmem:[#allocation5 + $0xc] sm:$0x3]  ;;  %v55_v15 = vld [vmem:[#allocation5 + $0xe] sm:$0x3] }
  0x2c   :  { %v57_v17 = vmul.f32 0.5, %v41_v1  ;;  %v58_v18 = vmul.f32 0.5, %v42_v2  ;;  %v413_v19 = vmul.f32 0.5, %v43_v3  ;;  %v60_v20 = vmul.f32 0.5, %v44_v4  ;;  %s373_s1 = smov [#allocation7]  }
  0x2d   :  { %v61_v21 = vmul.f32 0.5, %v45_v5  ;;  %v415_v22 = vmul.f32 0.5, %v46_v6  ;;  %v417_v23 = vmul.f32 0.5, %v47_v7  ;;  %v64_v24 = vmul.f32 0.5, %v48_v8  ;;  %s240_s6 = sshll.u32 %s373_s1, 4  ;;  %s241_s6 = int_to_ptr.vmem [resolvable:$true] %s240_s6 }
  0x2e   :  { %v65_v25 = vmul.f32 0.5, %v49_v9  ;;  %v66_v26 = vmul.f32 0.5, %v50_v10  ;;  %v67_v27 = vmul.f32 0.5, %v51_v11  ;;  %v68_v28 = vmul.f32 0.5, %v52_v12  ;;  %s341_s8 = scalar_lea.vmem %s241_s6, 16  ;;  %s345_s9 = scalar_lea.vmem %s241_s6, 32 }
  0x2f   :  { %v69_v29 = vmul.f32 0.5, %v53_v13  ;;  %v70_v30 = vmul.f32 0.5, %v54_v14  ;;  %v71_v31 = vmul.f32 0.5, %v55_v15  ;;  %v73_v32 = vsel %vm72_vm0, %v56_v16, -inf  ;;  %p342_p2 = scmp.ne.s32.totalorder %s241_s6, %s341_s8  ;;  %p346_p3 = scmp.lt.s32.totalorder %s241_s6, %s241_s6 }
  0x30   :  { %v74_v33 = vsel %vm72_vm0, %v57_v17, -inf  ;;  %v75_v34 = vsel %vm72_vm0, %v58_v18, -inf  ;;  %v77_v35 = vsel %vm72_vm0, %v413_v19, -inf  ;;  %v80_v38 = vsel %vm72_vm0, %v60_v20, -inf  ;;  %p347_p4 = scmp.lt.s32.totalorder %s345_s9, %s341_s8 }
  0x31   :  { %v76_v36 = vmax.f32 %v73_v32, %v75_v34  ;;  %v78_v37 = vmax.f32 %v74_v33, %v77_v35  ;;  %v81_v39 = vsel %vm72_vm0, %v61_v21, -inf  ;;  %v82_v40 = vsel %vm72_vm0, %v415_v22, -inf }
  0x32   :  { %v84_v41 = vsel %vm72_vm0, %v417_v23, -inf  ;;  %v125_v42 = vsel %vm72_vm0, %v64_v24, -inf  ;;  %v126_v43 = vsel %vm72_vm0, %v65_v25, -inf  ;;  %v83_v45 = vmax.f32 %v80_v38, %v82_v40  ;;  %p348_p5 = por %p347_p4, %p346_p3 }
  0x33   :  { %v79_v44 = vmax.f32 %v76_v36, %v78_v37  ;;  %v85_v46 = vmax.f32 %v81_v39, %v84_v41  ;;  %v127_v47 = vsel %vm72_vm0, %v66_v26, -inf  ;;  %v129_v49 = vsel %vm72_vm0, %v67_v27, -inf }
  0x34   :  { %v128_v48 = vmax.f32 %v125_v42, %v127_v47  ;;  %v130_v53 = vmax.f32 %v126_v43, %v129_v49  ;;  %v132_v54 = vsel %vm72_vm0, %v68_v28, -inf  ;;  %v134_v55 = vsel %vm72_vm0, %v70_v30, -inf  ;;  %p349_p6 = pnand %p348_p5, %p342_p2 }
  0x35   :  { %v86_v50 = vmax.f32 %v83_v45, %v85_v46  ;;  %v434_v51 = vsub.f32 %v56_v16, %v79_v44  ;;  %v436_v52 = vsub.f32 %v57_v17, %v79_v44  ;;  %v440_v56 = vsub.f32 %v58_v18, %v79_v44 }
  0x36   :  { %v133_v57 = vsel %vm72_vm0, %v69_v29, -inf  ;;  %v136_v58 = vsel %vm72_vm0, %v71_v31, -inf  ;;  %v131_v60 = vmax.f32 %v128_v48, %v130_v53  ;;  %v135_v63 = vmax.f32 %v132_v54, %v134_v55 }
  0x37   :  { %v444_v59 = vsub.f32 %v60_v20, %v86_v50  ;;  %v446_v61 = vsub.f32 %v61_v21, %v86_v50  ;;  %v95_v62 = vmul.f32 1.442695, %v434_v51  ;;  %v97_v0 = vmul.f32 1.442695, %v436_v52 }
  0x38   :  { %v137_v1 = vmax.f32 %v133_v57, %v136_v58  ;;  %v99_v2 = vmul.f32 1.442695, %v440_v56  ;;  %v451_v3 = vsub.f32 %v64_v24, %v131_v60  ;;  %v453_v4 = vsub.f32 %v65_v25, %v131_v60 }
  0x39   :  { %v103_v5 = vmul.f32 1.442695, %v444_v59  ;;  %v456_v7 = vsub.f32 %v66_v26, %v131_v60  ;;  %257 = vpow2.f32 %v95_v62  ;;  %v105_v8 = vmul.f32 1.442695, %v446_v61 }
  0x3a   :  { %v138_v6 = vmax.f32 %v135_v63, %v137_v1  ;;  %v459_v9 = vsub.f32 %v67_v27, %v131_v60  ;;  %259 = vpow2.f32 %v97_v0  ;;  %v147_v11 = vmul.f32 1.442695, %v451_v3 }
  0x3b   :  { %261 = vpow2.f32 %v99_v2  ;;  %v149_v13 = vmul.f32 1.442695, %v453_v4  ;;  %v151_v15 = vmul.f32 1.442695, %v456_v7  ;;  %v474_v18 = vsub.f32 %v413_v19, %v79_v44 }
  0x3c   :  { %v461_v10 = vsub.f32 %v68_v28, %v138_v6  ;;  %v464_v12 = vsub.f32 %v69_v29, %v138_v6  ;;  %263 = vpow2.f32 %v103_v5  ;;  %v467_v14 = vsub.f32 %v70_v30, %v138_v6 }
  0x3d   :  { %265 = vpow2.f32 %v105_v8  ;;  %v470_v16 = vsub.f32 %v71_v31, %v138_v6  ;;  %v153_v17 = vmul.f32 1.442695, %v459_v9  ;;  %v478_v21 = vsub.f32 %v415_v22, %v86_v50 }
  0x3e   :  { %267 = vpow2.f32 %v147_v11  ;;  %v155_v20 = vmul.f32 1.442695, %v461_v10  ;;  %v157_v24 = vmul.f32 1.442695, %v464_v12  ;;  %v159_v25 = vmul.f32 1.442695, %v467_v14 }
  0x3f   :  { %269 = vpow2.f32 %v149_v13  ;;  %v161_v26 = vmul.f32 1.442695, %v470_v16  ;;  %v484_v27 = vsub.f32 %v417_v23, %v86_v50  ;;  %v101_v19 = vmul.f32 1.442695, %v474_v18 }
  0x40   :  { %271 = vpow2.f32 %v151_v15  ;;  %v107_v29 = vmul.f32 1.442695, %v478_v21  ;;  %v179_v50 = vsub.f32 %v451_v3, %v434_v51  ;;  %v180_v53 = vsub.f32 %v453_v4, %v436_v52 }
  0x41   :  { %273 = vpow2.f32 %v153_v17  ;;  %v109_v32 = vmul.f32 1.442695, %v484_v27  ;;  %v181_v52 = vsub.f32 %v456_v7, %v440_v56  ;;  %v183_v3 = vsub.f32 %v461_v10, %v444_v59 }
  0x42   :  { %275 = vpow2.f32 %v155_v20  ;;  %v184_v11 = vsub.f32 %v464_v12, %v446_v61  ;;  %v182_v56 = vsub.f32 %v459_v9, %v474_v18  ;;  %v185_v59 = vsub.f32 %v467_v14, %v478_v21 }
  0x43   :  { %v258_v28 = vpop.eup %257  ;;  %277 = vpow2.f32 %v157_v24  ;;  %vm232_vm1 = vcmask 0  }
  0x44   :  { %v260_v22 = vpop.eup %259  ;;  %279 = vpow2.f32 %v159_v25  ;;  %v111_v42 = vsel %vm72_vm0, %v258_v28, 0.0 }
  0x45   :  { %v262_v30 = vpop.eup %261  ;;  %281 = vpow2.f32 %v161_v26  ;;  %v112_v43 = vsel %vm72_vm0, %v260_v22, 0.0 }
  0x46   :  { %v264_v31 = vpop.eup %263  ;;  %283 = vpow2.f32 %v101_v19  ;;  %v113_v55 = vadd.f32 %v112_v43, %v111_v42  ;;  %v114_v63 = vsel %vm72_vm0, %v262_v30, 0.0 }
  0x47   :  { %v266_v33 = vpop.eup %265  ;;  %285 = vpow2.f32 %v107_v29  ;;  %v118_v0 = vsel %vm72_vm0, %v264_v31, 0.0  ;;  %v186_v29 = vsub.f32 %v470_v16, %v484_v27 }
  0x48   :  { %v268_v34 = vpop.eup %267  ;;  %287 = vpow2.f32 %v109_v32  ;;  %v119_v1 = vsel %vm72_vm0, %v266_v33, 0.0  ;;  %v115_v4 = vadd.f32 %v114_v63, %v113_v55 }
  0x49   :  { %v270_v23 = vpop.eup %269  ;;  %v163_v35 = vsel %vm72_vm0, %v268_v34, 0.0  ;;  %v120_v6 = vadd.f32 %v119_v1, %v118_v0  ;;  %v187_v20 = vmul.f32 %v268_v34, %v179_v50 }
  0x4a   :  { %v272_v36 = vpop.eup %271  ;;  %v164_v37 = vsel %vm72_vm0, %v270_v23, 0.0  ;;  %v188_v24 = vmul.f32 %v270_v23, %v180_v53 }
  0x4b   :  { %v274_v38 = vpop.eup %273  ;;  %v165_v39 = vadd.f32 %v164_v37, %v163_v35  ;;  %v166_v40 = vsel %vm72_vm0, %v272_v36, 0.0  ;;  %v189_v26 = vmul.f32 %v272_v36, %v181_v52  ;;  %v195_v19 = vsel %vm72_vm0, %v187_v20, 0.0 }
  0x4c   :  { %v276_v41 = vpop.eup %275  ;;  %v168_v44 = vsel %vm72_vm0, %v274_v38, 0.0  ;;  %v196_v28 = vsel %vm72_vm0, %v188_v24, 0.0  ;;  %v190_v9 = vmul.f32 %v274_v38, %v182_v56 }
  0x4d   :  { %v278_v45 = vpop.eup %277  ;;  %v167_v46 = vadd.f32 %v166_v40, %v165_v39  ;;  %v170_v47 = vsel %vm72_vm0, %v276_v41, 0.0  ;;  %v191_v61 = vmul.f32 %v276_v41, %v183_v3  ;;  %v197_v18 = vadd.f32 %v196_v28, %v195_v19 }
  0x4e   :  { %v280_v48 = vpop.eup %279  ;;  %v171_v49 = vsel %vm72_vm0, %v278_v45, 0.0  ;;  %v192_v12 = vmul.f32 %v278_v45, %v184_v11  ;;  %v198_v14 = vsel %vm72_vm0, %v189_v26, 0.0  ;;  %v200_v37 = vsel %vm72_vm0, %v190_v9, 0.0 }
  0x4f   :  { %v282_v54 = vpop.eup %281  ;;  %v169_v57 = vadd.f32 %v168_v44, %v167_v46  ;;  %v172_v58 = vadd.f32 %v171_v49, %v170_v47  ;;  %v173_v60 = vsel %vm72_vm0, %v280_v48, 0.0  ;;  %v193_v21 = vmul.f32 %v280_v48, %v185_v59 }
  0x50   :  { %v284_v62 = vpop.eup %283  ;;  %v175_v2 = vsel %vm72_vm0, %v282_v54, 0.0  ;;  %v202_v31 = vsel %vm72_vm0, %v191_v61, 0.0  ;;  %v203_v32 = vsel %vm72_vm0, %v192_v12, 0.0  ;;  %v199_v23 = vadd.f32 %v198_v14, %v197_v18 }
  0x51   :  { %v286_v5 = vpop.eup %285  ;;  %v174_v51 = vadd.f32 %v173_v60, %v172_v58  ;;  %289 = vrcp.f32 %v169_v57  ;;  %v116_v15 = vsel %vm72_vm0, %v284_v62, 0.0  ;;  %v204_v35 = vadd.f32 %v203_v32, %v202_v31 }
  0x52   :  { %v288_v13 = vpop.eup %287  ;;  %v121_v17 = vsel %vm72_vm0, %v286_v5, 0.0  ;;  %v117_v7 = vadd.f32 %v116_v15, %v115_v4  ;;  %v194_v36 = vmul.f32 %v282_v54, %v186_v29  ;;  %v205_v16 = vsel %vm72_vm0, %v193_v21, 0.0 }
  0x53   :  { %v176_v8 = vadd.f32 %v175_v2, %v174_v51  ;;  %v122_v10 = vadd.f32 %v121_v17, %v120_v6  ;;  %v123_v25 = vsel %vm72_vm0, %v288_v13, 0.0  ;;  %v201_v38 = vadd.f32 %v200_v37, %v199_v23 }
  0x54   :  { %v206_v39 = vadd.f32 %v205_v16, %v204_v35  ;;  %v207_v40 = vsel %vm72_vm0, %v194_v36, 0.0 }
  0x55   :  { %291 = vrcp.f32 %v176_v8  ;;  %v124_v30 = vadd.f32 %v123_v25, %v122_v10 }
  0x56   :  { %v208_v41 = vadd.f32 %v207_v40, %v206_v39 }
  0x5b   :  { %v290_v22 = vpop.eup %289 }
  0x5c   :  { %v211_v33 = vmul.f32 %v290_v22, %v117_v7  ;;  %v209_v42 = vmul.f32 %v290_v22, %v201_v38 }
  0x5e   :  { %293 = vlog2.f32 %v211_v33 }
  0x5f   :  { %v292_v34 = vpop.eup %291 }
  0x60   :  { %v212_v27 = vmul.f32 %v292_v34, %v124_v30  ;;  %v210_v45 = vmul.f32 %v292_v34, %v208_v41 }
  0x62   :  { %295 = vlog2.f32 %v212_v27 }
  0x68   :  { %v294_v43 = vpop.eup %293 }
  0x69   :  { %v214_v44 = vmul.f32 0.6931472, %v294_v43 }
  0x6b   :  { %v217_v46 = vadd.f32 %v214_v44, %v209_v42 }
  0x6c   :  { %v296_v47 = vpop.eup %295 }
  0x6d   :  { %v216_v48 = vmul.f32 0.6931472, %v296_v47  ;;  %v219_v50 = vsel %vm72_vm0, %v217_v46, 0.0 }
  0x6f   :  { %v218_v49 = vadd.f32 %v216_v48, %v210_v45 }
  0x71   :  { %v220_v53 = vsel %vm72_vm0, %v218_v49, 0.0 }
  0x72   :  { %v221_v54 = vadd.f32 %v220_v53, %v219_v50 }
  0x74   :  { %222 = vadd.xlane.f32.xlu0 %v221_v54 }
 0x101   :  { %v223_v55 = vpop.xlane.xlu0 %222 }
 0x102   :  { %v224_v57 = vrot.slane %v223_v55, 4 }
 0x104   :  { %v225_v58 = vadd.f32 %v224_v57, %v223_v55 }
 0x106   :  { %v226_v60 = vrot.slane %v225_v58, 2 }
 0x108   :  { %v227_v62 = vadd.f32 %v226_v60, %v225_v58 }
 0x10a   :  { %v228_v63 = vrot.slane %v227_v62, 1 }
 0x10c   :  { %v229_v0 = vadd.f32 %v228_v63, %v227_v62 }
 0x10e   :  { %250 = vpush %v229_v0 }
 0x13f   :  { %s251_s7 = spop %250 }
 0x140   :  { %v231_v1 = vstv %s251_s7 }
 0x141   :  { %233 = vst.msk [vmem:[#allocation7] sm:$0x1] %vm232_vm1, %v231_v1 }
 0x142   :  { %352 = shalt.err (!%p349_p6)
}
 0x143   :  { %s353_s12 = scalar_lea.hbm %s545_s2, 16 }
 0x144   :  { %p354_p7 = scmp.ne.s32.totalorder %s545_s2, %s353_s12  ;;  %p357_p8 = scmp.lt.u32.totalorder %s353_s12, %s545_s2 }
 0x146   :  { %p359_p9 = pnand %p357_p8, %p354_p7 }
 0x148   :  { %362 = shalt.err (!%p359_p9)
}
 0x149   :  { %243 = dma.vmem_to_hbm [thread:$0]  %s241_s6, 16, %s545_s2, [#allocation4]  }
 0x14a   :  { %367 = dma.done.wait [#allocation4], 16  }
 0x14b   :  { %368 = vsyncadd [#allocation4], 4294967280 }
 0x14c   :  { %247 = vsyncpa [#allocation3], 1 }
 0x14d   :  { %248 = vsyncpa [#allocation6], 1 }
 0x14e   :  { %249 = vsyncpa [#allocation4], 1 }

</bundles_post_ra>
